<compile_context>
chip_gen: v7x
topology: tpu7x:2x2x1
jax: 0.10.0
libtpu: 0.0.40
codegen_flags: <defaults>
</compile_context>

<pallas_src>
import math

import jax
import jax.numpy as jnp
from jax.experimental import pallas as pl
from jax.experimental.pallas import tpu as pltpu


def _sentinal_kernel(ci_ref, dh_ref, mc_ref, wi_ref, wh_ref, out_ref):
    # ci_ref : (tile, pack*E)  f32   packed concat_input rows
    # dh_ref : (tile, pack*H)  f32   packed decoder_hidden rows
    # mc_ref : (tile, pack*H)        packed memory_cell rows
    # wi_ref : (pack*E, pack*H) f32  block-diag kron(I, W_inp^T), VMEM-resident
    # wh_ref : (pack*H, pack*H) f32  block-diag kron(I, W_hidd^T), VMEM-resident
    # Two tiny MXU dots, f32 accumulation; EUP sigmoid/tanh; VPU multiply;
    # lane-dense (128-wide) store.
    z = jnp.dot(ci_ref[...], wi_ref[...], preferred_element_type=jnp.float32)
    z = z + jnp.dot(dh_ref[...], wh_ref[...], preferred_element_type=jnp.float32)
    st = jax.nn.sigmoid(z) * jnp.tanh(mc_ref[...].astype(jnp.float32))
    out_ref[...] = st.astype(out_ref.dtype)


def prepare_sentinal_params(w_inp, w_hidd, pack=4, dtype=jnp.float32):
    """One-time (hoisted) weight prep.

    nn.Linear stores (out_features, in_features); the matmul operand is the
    transpose.  `pack` consecutive batch rows are merged into one kernel row,
    so each weight is replicated block-diagonally:
        (B/pack, pack*In) @ kron(I_pack, W^T)  ==  per-row  x @ W^T
    which makes the H(=32)-lane output a lane-dense pack*H(=128)-lane slab at
    zero extra HBM traffic.  `pack` must divide the batch size.
    """
    wi = jnp.asarray(w_inp, dtype).T    # (E, H)
    wh = jnp.asarray(w_hidd, dtype).T   # (H, H)
    if pack > 1:
        eye = jnp.eye(pack, dtype=dtype)
        wi = jnp.kron(eye, wi)          # (pack*E, pack*H), block-diagonal
        wh = jnp.kron(eye, wh)          # (pack*H, pack*H), block-diagonal
    return wi, wh


def _pick_tiling(rows):
    """Rows = packed batch rows.  Returns (tile_rows, grid_steps)."""
    # Small/medium: one full-extent block — no padding, no (8,128) constraint,
    # zero extra per-step overhead.
    if rows < 2048 or rows % 16 != 0:
        return rows, 1
    # Large: 2 "parallel" steps so both v7x TensorCores get a tile; double the
    # step count only to keep tiles ~<=2K rows (~1 MiB/operand, comfortably
    # inside default scoped VMEM on v5e/v6e/v7x even double-buffered).
    steps = 2
    while (rows // steps > 2048 and rows % (2 * steps) == 0
           and (rows // (2 * steps)) % 8 == 0):
        steps *= 2
    # TODO(synk): pathological huge batches with awkward divisibility may leave
    #             an oversized tile; raise vmem_limit_bytes or pad in that case.
    return rows // steps, steps


def sentinal_forward(concat_input, decoder_hidden, memory_cell,
                     w_inp_packed, w_hidd_packed):
    """concat_input: (B, E); decoder_hidden, memory_cell: (B, H);
    w_*_packed: from prepare_sentinal_params (hoisted, per-model constant)."""
    B, E = concat_input.shape
    H = decoder_hidden.shape[1]
    assert decoder_hidden.shape == (B, H) and memory_cell.shape == (B, H)

    pack = w_inp_packed.shape[0] // E
    Ep, Hp = pack * E, pack * H
    assert w_inp_packed.shape == (Ep, Hp), "w_inp_packed shape mismatch"
    assert w_hidd_packed.shape == (Hp, Hp), "w_hidd_packed shape mismatch"
    assert B % pack == 0, "batch must be divisible by the lane-packing factor"

    rows = B // pack
    # Free row-major views: `pack` consecutive batch rows -> one 128-lane row.
    ci = concat_input.reshape(rows, Ep)
    dh = decoder_hidden.reshape(rows, Hp)
    mc = memory_cell.reshape(rows, Hp)

    tile, steps = _pick_tiling(rows)
    out_dtype = memory_cell.dtype

    out = pl.pallas_call(
        _sentinal_kernel,
        out_shape=jax.ShapeDtypeStruct((rows, Hp), out_dtype),
        grid=(steps,),
        in_specs=[
            pl.BlockSpec((tile, Ep), lambda i: (i, 0)),   # packed concat_input
            pl.BlockSpec((tile, Hp), lambda i: (i, 0)),   # packed decoder_hidden
            pl.BlockSpec((tile, Hp), lambda i: (i, 0)),   # packed memory_cell
            pl.BlockSpec((Ep, Hp), lambda i: (0, 0)),     # weight, VMEM-resident
            pl.BlockSpec((Hp, Hp), lambda i: (0, 0)),     # weight, VMEM-resident
        ],
        out_specs=pl.BlockSpec((tile, Hp), lambda i: (i, 0)),
        compiler_params=pltpu.CompilerParams(
            dimension_semantics=("parallel",)),
        cost_estimate=pl.CostEstimate(
            flops=2 * B * (E + H) * H,
            transcendentals=2 * B * H,
            bytes_accessed=4 * (B * E + 3 * B * H + Ep * Hp + Hp * Hp)),
    )(ci, dh, mc, w_inp_packed, w_hidd_packed)

    # Free row-major view back to the module's (B, H) output shape.
    return out.reshape(B, H)


def xavier_uniform(key, out_features, in_features, dtype=jnp.float32):
    bound = math.sqrt(6.0 / (in_features + out_features))
    return jax.random.uniform(key, (out_features, in_features),
                              minval=-bound, maxval=bound, dtype=dtype)


if __name__ == "__main__":
    # Small shapes consistent with the module: embed=16 -> concat_input dim 32,
    # hidden=32, batch=256 (pack=4 -> 64 fully lane-dense 128-wide rows, grid=1).
    batch, embed_input, hidden = 256, 32, 32
    pack = 4

    key = jax.random.PRNGKey(0)
    k_ci, k_dh, k_mc, k_wh, k_wi = jax.random.split(key, 5)

    concat_input = jax.random.normal(k_ci, (batch, embed_input), jnp.float32)
    decoder_hidden = jax.random.normal(k_dh, (batch, hidden), jnp.float32)
    memory_cell = jax.random.normal(k_mc, (batch, hidden), jnp.float32)

    # nn.Linear weights in PyTorch (out, in) layout, xavier_uniform init.
    w_hidd = xavier_uniform(k_wh, hidden, hidden)
    w_inp = xavier_uniform(k_wi, hidden, embed_input)

    # One-time weight prep (transpose + block-diag lane packing), hoisted out
    # of the per-step forward.
    w_inp_p, w_hidd_p = prepare_sentinal_params(w_inp, w_hidd, pack=pack)

    fwd = jax.jit(sentinal_forward)
    st = fwd(concat_input, decoder_hidden, memory_cell, w_inp_p, w_hidd_p)
    st = jax.block_until_ready(st)
    assert st.shape == (batch, hidden)

    # Reference: PyTorch-equivalent f32 semantics (eval mode).
    ref = jax.nn.sigmoid(decoder_hidden @ w_hidd.T + concat_input @ w_inp.T) \
        * jnp.tanh(memory_cell)
    err = float(jnp.max(jnp.abs(st - ref)))
    assert err < 1e-2, f"max abs err {err}"

    print("KERNEL_OK")
</pallas_src>

<mosaic_0001>
module attributes {stable_mosaic.version = 11 : i64} {
  func.func @_sentinal_kernel(%arg0: i32, %arg1: memref<64x128xf32, #tpu.memory_space<vmem>>, %arg2: memref<64x128xf32, #tpu.memory_space<vmem>>, %arg3: memref<64x128xf32, #tpu.memory_space<vmem>>, %arg4: memref<128x128xf32, #tpu.memory_space<vmem>>, %arg5: memref<128x128xf32, #tpu.memory_space<vmem>>, %arg6: memref<64x128xf32, #tpu.memory_space<vmem>>) attributes {dimension_semantics = [#tpu.dimension_semantics<parallel>], iteration_bounds = array<i64: 1>, scalar_prefetch = 0 : i64, scratch_operands = 0 : i64, tpu.core_type = #tpu.core_type<tc>, window_params = [{transform_indices = @transform_0, window_bounds = array<i64: 64, 128>}, {transform_indices = @transform_1, window_bounds = array<i64: 64, 128>}, {transform_indices = @transform_2, window_bounds = array<i64: 64, 128>}, {pipeline_mode = #tpu.pipeline_mode<synchronous>, transform_indices = @transform_3, window_bounds = array<i64: 128, 128>}, {pipeline_mode = #tpu.pipeline_mode<synchronous>, transform_indices = @transform_4, window_bounds = array<i64: 128, 128>}, {transform_indices = @transform_5, window_bounds = array<i64: 64, 128>}]} {
    %c0 = arith.constant 0 : index
    %c0_0 = arith.constant 0 : index
    %0 = vector.load %arg1[%c0, %c0_0] : memref<64x128xf32, #tpu.memory_space<vmem>>, vector<64x128xf32>
    %c0_1 = arith.constant 0 : index
    %c0_2 = arith.constant 0 : index
    %1 = vector.load %arg4[%c0_1, %c0_2] : memref<128x128xf32, #tpu.memory_space<vmem>>, vector<128x128xf32>
    %cst = arith.constant dense<0.000000e+00> : vector<64x128xf32>
    %2 = tpu.matmul %0, %1, %cst {dimension_numbers = #tpu.dot_dimension_numbers<[1], [0], [0], [1], [0, 0, 1, 1], [], []>} : vector<64x128xf32>, vector<128x128xf32>, vector<64x128xf32> -> vector<64x128xf32>
    %c0_3 = arith.constant 0 : index
    %c0_4 = arith.constant 0 : index
    %3 = vector.load %arg2[%c0_3, %c0_4] : memref<64x128xf32, #tpu.memory_space<vmem>>, vector<64x128xf32>
    %c0_5 = arith.constant 0 : index
    %c0_6 = arith.constant 0 : index
    %4 = vector.load %arg5[%c0_5, %c0_6] : memref<128x128xf32, #tpu.memory_space<vmem>>, vector<128x128xf32>
    %cst_7 = arith.constant dense<0.000000e+00> : vector<64x128xf32>
    %5 = tpu.matmul %3, %4, %cst_7 {dimension_numbers = #tpu.dot_dimension_numbers<[1], [0], [0], [1], [0, 0, 1, 1], [], []>} : vector<64x128xf32>, vector<128x128xf32>, vector<64x128xf32> -> vector<64x128xf32>
    %6 = arith.addf %2, %5 : vector<64x128xf32>
    %7 = arith.negf %6 : vector<64x128xf32>
    %8 = math.exp %7 : vector<64x128xf32>
    %cst_8 = arith.constant 1.000000e+00 : f32
    %9 = vector.broadcast %cst_8 : f32 to vector<64x128xf32>
    %10 = arith.addf %9, %8 : vector<64x128xf32>
    %11 = arith.divf %9, %10 : vector<64x128xf32>
    %c0_9 = arith.constant 0 : index
    %c0_10 = arith.constant 0 : index
    %12 = vector.load %arg3[%c0_9, %c0_10] : memref<64x128xf32, #tpu.memory_space<vmem>>, vector<64x128xf32>
    %13 = math.tanh %12 : vector<64x128xf32>
    %14 = arith.mulf %11, %13 : vector<64x128xf32>
    %c0_11 = arith.constant 0 : index
    %c0_12 = arith.constant 0 : index
    %15 = vector.load %arg6[%c0_11, %c0_12] : memref<64x128xf32, #tpu.memory_space<vmem>>, vector<64x128xf32>
    tpu.vector_store %arg6[%c0_11, %c0_12], %14 {strides = array<i32>} : memref<64x128xf32, #tpu.memory_space<vmem>>, vector<64x128xf32>,
    return
  }
  func.func @transform_0(%arg0: i32) -> (i32, i32) {
    %c0_i32 = arith.constant 0 : i32
    %c0_i32_0 = arith.constant 0 : i32
    return %arg0, %c0_i32 : i32, i32
  }
  func.func @transform_1(%arg0: i32) -> (i32, i32) {
    %c0_i32 = arith.constant 0 : i32
    %c0_i32_0 = arith.constant 0 : i32
    return %arg0, %c0_i32 : i32, i32
  }
  func.func @transform_2(%arg0: i32) -> (i32, i32) {
    %c0_i32 = arith.constant 0 : i32
    %c0_i32_0 = arith.constant 0 : i32
    return %arg0, %c0_i32 : i32, i32
  }
  func.func @transform_3(%arg0: i32) -> (i32, i32) {
    %c0_i32 = arith.constant 0 : i32
    %c0_i32_0 = arith.constant 0 : i32
    %c0_i32_1 = arith.constant 0 : i32
    return %c0_i32, %c0_i32_0 : i32, i32
  }
  func.func @transform_4(%arg0: i32) -> (i32, i32) {
    %c0_i32 = arith.constant 0 : i32
    %c0_i32_0 = arith.constant 0 : i32
    %c0_i32_1 = arith.constant 0 : i32
    return %c0_i32, %c0_i32_0 : i32, i32
  }
  func.func @transform_5(%arg0: i32) -> (i32, i32) {
    %c0_i32 = arith.constant 0 : i32
    %c0_i32_0 = arith.constant 0 : i32
    return %arg0, %c0_i32 : i32, i32
  }
}

</mosaic_0001>

<bundles_post_ra>
// kernel: sentinal_forward.1
= control target key start
LH: loop header
LB: loop body
LE: loop exit
PB: predicated region body
PF: predicated region fallthrough
CT: control target
= control target key end

     0   :  { %s848_s4 = inlined_call_operand.vmem [shape: f32[128,128], index: 4, kind: input, shape index: {}]   ;;  %s849_s3 = inlined_call_operand.vmem [shape: f32[128,128], index: 3, kind: input, shape index: {}]   ;;  %s850_s1 = inlined_call_operand.vmem [shape: f32[64,128], index: 1, kind: input, shape index: {}]   ;;  %s851_s0 = inlined_call_operand.vmem [shape: f32[64,128], index: 0, kind: input, shape index: {}]   ;;  %s852_s2 = inlined_call_operand.vmem [shape: f32[64,128], index: 2, kind: input, shape index: {}]   ;;  %s853_s5 = inlined_call_operand.vmem [shape: f32[64,128], index: 5, kind: output, shape index: {}]  }
   0x1   :  { %v52_v0 = vld [vmem:[%s848_s4] sm:$0xff]  ;;  %v53_v1 = vld [vmem:[%s848_s4 + $0x8] sm:$0xff]  ;;  %v54_v5 = vld [vmem:[%s848_s4 + $0x10] sm:$0xff] }
   0x2   :  { %v28_v2 = vld [vmem:[%s849_s3] sm:$0xff]  ;;  %v506_v3 = vpack.c.bf16 %v53_v1, %v52_v0  ;;  %v29_v4 = vld [vmem:[%s849_s3 + $0x8] sm:$0xff]  ;;  %v55_v6 = vld [vmem:[%s848_s4 + $0x18] sm:$0xff] }
   0x3   :  { %v538_v7 = vpack.c.bf16 %v29_v4, %v28_v2  ;;  %v510_v8 = vpack.c.bf16 %v55_v6, %v54_v5  ;;  %v30_v9 = vld [vmem:[%s849_s3 + $0x10] sm:$0xff]  ;;  %v31_v10 = vld [vmem:[%s849_s3 + $0x18] sm:$0xff]  ;;  %v56_v11 = vld [vmem:[%s848_s4 + $0x20] sm:$0xff] }
   0x4   :  { %507 = vmatprep.subr.bf16.mxu1 %v506_v3  ;;  %v542_v12 = vpack.c.bf16 %v31_v10, %v30_v9  ;;  %v57_v13 = vld [vmem:[%s848_s4 + $0x28] sm:$0xff]  ;;  %v32_v14 = vld [vmem:[%s849_s3 + $0x20] sm:$0xff]  ;;  %v58_v18 = vld [vmem:[%s848_s4 + $0x30] sm:$0xff] }
   0x5   :  { %v33_v15 = vld [vmem:[%s849_s3 + $0x28] sm:$0xff]  ;;  %539 = vmatprep.subr.bf16.mxu0 %v538_v7  ;;  %509 = vmatpush3.bf16.msra.mxu1 %v506_v3  ;;  %v514_v16 = vpack.c.bf16 %v57_v13, %v56_v11  ;;  %v59_v19 = vld [vmem:[%s848_s4 + $0x38] sm:$0xff]  ;;  %v34_v20 = vld [vmem:[%s849_s3 + $0x30] sm:$0xff] }
   0x6   :  { %541 = vmatpush3.bf16.msra.mxu0 %v538_v7  ;;  %511 = vmatprep.subr.bf16.mxu1 %v510_v8  ;;  %v546_v17 = vpack.c.bf16 %v33_v15, %v32_v14  ;;  %v35_v21 = vld [vmem:[%s849_s3 + $0x38] sm:$0xff]  ;;  %v518_v22 = vpack.c.bf16 %v59_v19, %v58_v18  ;;  %v60_v24 = vld [vmem:[%s848_s4 + $0x40] sm:$0xff]  ;;  %v61_v25 = vld [vmem:[%s848_s4 + $0x48] sm:$0xff] }
   0x7   :  { %543 = vmatprep.subr.bf16.mxu0 %v542_v12  ;;  %v550_v23 = vpack.c.bf16 %v35_v21, %v34_v20  ;;  %v44_v26 = vld [vmem:[%s850_s1] sm:$0xff]  ;;  %v37_v28 = vld [vmem:[%s849_s3 + $0x48] sm:$0xff]  ;;  %v522_v30 = vpack.c.bf16 %v61_v25, %v60_v24  ;;  %v62_v32 = vld [vmem:[%s848_s4 + $0x50] sm:$0xff] }
   0x8   :  { %v36_v27 = vld [vmem:[%s849_s3 + $0x40] sm:$0xff]  ;;  %450 = vmatprep.mubr.f32.mxu1 %v44_v26  ;;  %v63_v33 = vld [vmem:[%s848_s4 + $0x58] sm:$0xff]  ;;  %v38_v34 = vld [vmem:[%s849_s3 + $0x50] sm:$0xff] }
   0x9   :  { %513 = vmatpush3.bf16.msra.mxu1 %v510_v8  ;;  %v20_v29 = vld [vmem:[%s851_s0] sm:$0xff]  ;;  %v554_v31 = vpack.c.bf16 %v37_v28, %v36_v27  ;;  %v39_v35 = vld [vmem:[%s849_s3 + $0x58] sm:$0xff]  ;;  %v526_v36 = vpack.c.bf16 %v63_v33, %v62_v32  ;;  %v65_v39 = vld [vmem:[%s848_s4 + $0x68] sm:$0xff] }
   0xa   :  { %545 = vmatpush3.bf16.msra.mxu0 %v542_v12  ;;  %515 = vmatprep.subr.bf16.mxu1 %v514_v16  ;;  %v558_v37 = vpack.c.bf16 %v39_v35, %v38_v34  ;;  %v64_v38 = vld [vmem:[%s848_s4 + $0x60] sm:$0xff]  ;;  %v41_v41 = vld [vmem:[%s849_s3 + $0x68] sm:$0xff]  ;;  %v66_v44 = vld [vmem:[%s848_s4 + $0x70] sm:$0xff] }
   0xb   :  { %547 = vmatprep.subr.bf16.mxu0 %v546_v17  ;;  %494 = vmatprep.mubr.f32.mxu0 %v20_v29  ;;  %v40_v40 = vld [vmem:[%s849_s3 + $0x60] sm:$0xff]  ;;  %v530_v42 = vpack.c.bf16 %v65_v39, %v64_v38  ;;  %v67_v45 = vld [vmem:[%s848_s4 + $0x78] sm:$0xff]  ;;  %v42_v46 = vld [vmem:[%s849_s3 + $0x70] sm:$0xff] }
   0xc   :  { %v562_v43 = vpack.c.bf16 %v41_v41, %v40_v40  ;;  %v43_v47 = vld [vmem:[%s849_s3 + $0x78] sm:$0xff]  ;;  %v534_v48 = vpack.c.bf16 %v67_v45, %v66_v44  ;;  %v45_v50 = vld [vmem:[%s850_s1 + $0x8] sm:$0xff]  ;;  %v46_v52 = vld [vmem:[%s850_s1 + $0x10] sm:$0xff] }
   0xd   :  { %517 = vmatpush3.bf16.msra.mxu1 %v514_v16  ;;  %v566_v49 = vpack.c.bf16 %v43_v47, %v42_v46  ;;  %v21_v51 = vld [vmem:[%s851_s0 + $0x8] sm:$0xff]  ;;  %v22_v53 = vld [vmem:[%s851_s0 + $0x10] sm:$0xff]  ;;  %v47_v54 = vld [vmem:[%s850_s1 + $0x18] sm:$0xff] }
   0xe   :  { %549 = vmatpush3.bf16.msra.mxu0 %v546_v17  ;;  %519 = vmatprep.subr.bf16.mxu1 %v518_v22  ;;  %v23_v55 = vld [vmem:[%s851_s0 + $0x18] sm:$0xff]  ;;  %v48_v56 = vld [vmem:[%s850_s1 + $0x20] sm:$0xff]  ;;  %v49_v58 = vld [vmem:[%s850_s1 + $0x28] sm:$0xff] }
   0xf   :  { %551 = vmatprep.subr.bf16.mxu0 %v550_v23  ;;  %v24_v57 = vld [vmem:[%s851_s0 + $0x20] sm:$0xff]  ;;  %v25_v59 = vld [vmem:[%s851_s0 + $0x28] sm:$0xff]  ;;  %v50_v60 = vld [vmem:[%s850_s1 + $0x30] sm:$0xff] }
  0x10   :  { %v26_v61 = vld [vmem:[%s851_s0 + $0x30] sm:$0xff]  ;;  %v51_v62 = vld [vmem:[%s850_s1 + $0x38] sm:$0xff]  ;;  %v327_v19 = vld [vmem:[%s852_s2 + $0x8] sm:$0xff] }
  0x11   :  { %521 = vmatpush3.bf16.msra.mxu1 %v518_v22  ;;  %v27_v63 = vld [vmem:[%s851_s0 + $0x38] sm:$0xff]  ;;  %v326_v25 = vld [vmem:[%s852_s2] sm:$0xff]  ;;  %v328_v39 = vld [vmem:[%s852_s2 + $0x10] sm:$0xff] }
  0x12   :  { %553 = vmatpush3.bf16.msra.mxu0 %v550_v23  ;;  %523 = vmatprep.subr.bf16.mxu1 %v522_v30  ;;  %v329_v29 = vld [vmem:[%s852_s2 + $0x18] sm:$0xff]  ;;  %v331_v44 = vld [vmem:[%s852_s2 + $0x28] sm:$0xff]  ;;  %v330_v46 = vld [vmem:[%s852_s2 + $0x20] sm:$0xff] }
  0x13   :  { %555 = vmatprep.subr.bf16.mxu0 %v554_v31 }
  0x15   :  { %525 = vmatpush3.bf16.msra.mxu1 %v522_v30 }
  0x16   :  { %557 = vmatpush3.bf16.msra.mxu0 %v554_v31  ;;  %527 = vmatprep.subr.bf16.mxu1 %v526_v36 }
  0x17   :  { %559 = vmatprep.subr.bf16.mxu0 %v558_v37 }
  0x19   :  { %529 = vmatpush3.bf16.msra.mxu1 %v526_v36 }
  0x1a   :  { %561 = vmatpush3.bf16.msra.mxu0 %v558_v37  ;;  %531 = vmatprep.subr.bf16.mxu1 %v530_v42 }
  0x1b   :  { %563 = vmatprep.subr.bf16.mxu0 %v562_v43 }
  0x1d   :  { %533 = vmatpush3.bf16.msra.mxu1 %v530_v42 }
  0x1e   :  { %565 = vmatpush3.bf16.msra.mxu0 %v562_v43  ;;  %535 = vmatprep.subr.bf16.mxu1 %v534_v48 }
  0x1f   :  { %567 = vmatprep.subr.bf16.mxu0 %v566_v49 }
  0x21   :  { %537 = vmatpush3.bf16.msra.mxu1 %v534_v48 }
  0x22   :  { %569 = vmatpush3.bf16.msra.mxu0 %v566_v49 }
  0x24   :  { %451 = vmatmul.mubr.f32.vlgmr.msra.gmra.mrb[0].mxu1 %v45_v50 }
  0x25   :  { %495 = vmatmul.mubr.f32.vlgmr.msra.gmra.mrb[0].mxu0 %v21_v51  ;;  %453 = vmatprep.mubr.f32.mxu1 %v46_v52  ;;  %v333_v52 = vld [vmem:[%s852_s2 + $0x38] sm:$0xff] }
  0x26   :  { %497 = vmatprep.mubr.f32.mxu0 %v22_v53 }
  0x28   :  { %454 = vmatmul.mubr.f32.gmra.mrb[2].mxu1 %v47_v54 }
  0x29   :  { %498 = vmatmul.mubr.f32.gmra.mrb[2].mxu0 %v23_v55  ;;  %456 = vmatprep.mubr.f32.mxu1 %v48_v56 }
  0x2a   :  { %500 = vmatprep.mubr.f32.mxu0 %v24_v57  ;;  %v332_v57 = vld [vmem:[%s852_s2 + $0x30] sm:$0xff] }
  0x2c   :  { %457 = vmatmul.mubr.f32.gmra.mrb[4].mxu1 %v49_v58 }
  0x2d   :  { %501 = vmatmul.mubr.f32.gmra.mrb[4].mxu0 %v25_v59  ;;  %459 = vmatprep.mubr.f32.mxu1 %v50_v60 }
  0x2e   :  { %503 = vmatprep.mubr.f32.mxu0 %v26_v61 }
  0x30   :  { %460 = vmatmul.mubr.f32.gmra.mrb[6].mxu1 %v51_v62 }
  0x31   :  { %504 = vmatmul.mubr.f32.gmra.mrb[6].mxu0 %v27_v63 }
  0xf7   :  { %v452_v0 = vpop.f32.mrb[0].mxu1 }
  0xf8   :  { %v496_v1 = vpop.f32.mrb[0].mxu0  ;;  %v134_v2 = vpop.f32.mrb[1].mxu1 }
  0xf9   :  { %v245_v3 = vadd.f32 %v496_v1, %v452_v0  ;;  %v239_v4 = vpop.f32.mrb[1].mxu0 }
  0xfa   :  { %v240_v5 = vadd.f32 %v239_v4, %v134_v2 }
  0xfb   :  { %v363_v6 = vmul.f32 -1.442695, %v245_v3  ;;  %v455_v7 = vpop.f32.mrb[2].mxu1 }
  0xfc   :  { %v362_v8 = vmul.f32 -1.442695, %v240_v5  ;;  %v499_v9 = vpop.f32.mrb[2].mxu0  ;;  %v144_v10 = vpop.f32.mrb[3].mxu1 }
  0xfd   :  { %578 = vpow2.f32 %v363_v6  ;;  %v255_v11 = vadd.f32 %v499_v9, %v455_v7  ;;  %v249_v12 = vpop.f32.mrb[3].mxu0 }
  0xfe   :  { %580 = vpow2.f32 %v362_v8  ;;  %v250_v13 = vadd.f32 %v249_v12, %v144_v10 }
  0xff   :  { %v365_v14 = vmul.f32 -1.442695, %v255_v11  ;;  %v458_v15 = vpop.f32.mrb[4].mxu1 }
 0x100   :  { %v364_v16 = vmul.f32 -1.442695, %v250_v13  ;;  %v502_v17 = vpop.f32.mrb[4].mxu0  ;;  %v154_v18 = vpop.f32.mrb[5].mxu1 }
 0x101   :  { %582 = vpow2.f32 %v365_v14  ;;  %v265_v20 = vadd.f32 %v502_v17, %v458_v15  ;;  %v259_v21 = vpop.f32.mrb[5].mxu0 }
 0x102   :  { %584 = vpow2.f32 %v364_v16  ;;  %v260_v22 = vadd.f32 %v259_v21, %v154_v18 }
 0x103   :  { %v367_v23 = vmul.f32 -1.442695, %v265_v20  ;;  %v461_v24 = vpop.f32.mrb[6].mxu1  ;;  %586 = vtanh.f32 %v327_v19 }
 0x104   :  { %v366_v26 = vmul.f32 -1.442695, %v260_v22  ;;  %v505_v27 = vpop.f32.mrb[6].mxu0  ;;  %v164_v28 = vpop.f32.mrb[7].mxu1 }
 0x105   :  { %588 = vpow2.f32 %v367_v23  ;;  %v275_v30 = vadd.f32 %v505_v27, %v461_v24  ;;  %v269_v31 = vpop.f32.mrb[7].mxu0 }
 0x106   :  { %590 = vpow2.f32 %v366_v26  ;;  %v270_v32 = vadd.f32 %v269_v31, %v164_v28 }
 0x107   :  { %v579_v33 = vpop.eup %578  ;;  %592 = vtanh.f32 %v326_v25  ;;  %v369_v34 = vmul.f32 -1.442695, %v275_v30 }
 0x108   :  { %v581_v35 = vpop.eup %580  ;;  %v303_v36 = vadd.f32 1.0, %v579_v33  ;;  %594 = vtanh.f32 %v329_v29  ;;  %v368_v37 = vmul.f32 -1.442695, %v270_v32 }
 0x109   :  { %v302_v38 = vadd.f32 1.0, %v581_v35  ;;  %596 = vpow2.f32 %v369_v34 }
 0x10a   :  { %598 = vrcp.f32 %v303_v36 }
 0x10b   :  { %v583_v40 = vpop.eup %582  ;;  %600 = vrcp.f32 %v302_v38 }
 0x10c   :  { %v585_v41 = vpop.eup %584  ;;  %v305_v42 = vadd.f32 1.0, %v583_v40  ;;  %602 = vpow2.f32 %v368_v37 }
 0x10d   :  { %v304_v43 = vadd.f32 1.0, %v585_v41  ;;  %604 = vtanh.f32 %v328_v39  ;;  %v587_v45 = vpop.eup %586 }
 0x10e   :  { %606 = vrcp.f32 %v305_v42 }
 0x10f   :  { %v589_v47 = vpop.eup %588  ;;  %608 = vrcp.f32 %v304_v43 }
 0x110   :  { %v591_v48 = vpop.eup %590  ;;  %v307_v49 = vadd.f32 1.0, %v589_v47  ;;  %610 = vtanh.f32 %v331_v44 }
 0x111   :  { %v593_v50 = vpop.eup %592  ;;  %v306_v51 = vadd.f32 1.0, %v591_v48  ;;  %612 = vtanh.f32 %v330_v46 }
 0x112   :  { %v595_v53 = vpop.eup %594  ;;  %614 = vrcp.f32 %v307_v49 }
 0x113   :  { %v597_v54 = vpop.eup %596  ;;  %616 = vrcp.f32 %v306_v51 }
 0x114   :  { %v599_v55 = vpop.eup %598  ;;  %v309_v56 = vadd.f32 1.0, %v597_v54  ;;  %618 = vtanh.f32 %v333_v52 }
 0x115   :  { %v601_v58 = vpop.eup %600  ;;  %v343_v59 = vmul.f32 %v599_v55, %v587_v45 }
 0x116   :  { %v603_v60 = vpop.eup %602  ;;  %v342_v61 = vmul.f32 %v601_v58, %v593_v50  ;;  %620 = vrcp.f32 %v309_v56 }
 0x117   :  { %v605_v62 = vpop.eup %604  ;;  %351 = vst [vmem:[%s853_s5 + $0x8] sm:$0xff] %v343_v59  ;;  %v308_v63 = vadd.f32 1.0, %v603_v60  ;;  %622 = vtanh.f32 %v332_v57 }
 0x118   :  { %v607_v0 = vpop.eup %606  ;;  %350 = vst [vmem:[%s853_s5] sm:$0xff] %v342_v61 }
 0x119   :  { %v609_v1 = vpop.eup %608  ;;  %v345_v2 = vmul.f32 %v607_v0, %v595_v53  ;;  %624 = vrcp.f32 %v308_v63 }
 0x11a   :  { %v611_v3 = vpop.eup %610  ;;  %v344_v4 = vmul.f32 %v609_v1, %v605_v62 }
 0x11b   :  { %v613_v5 = vpop.eup %612  ;;  %353 = vst [vmem:[%s853_s5 + $0x18] sm:$0xff] %v345_v2 }
 0x11c   :  { %v615_v6 = vpop.eup %614  ;;  %352 = vst [vmem:[%s853_s5 + $0x10] sm:$0xff] %v344_v4 }
 0x11d   :  { %v617_v7 = vpop.eup %616  ;;  %v347_v8 = vmul.f32 %v615_v6, %v611_v3 }
 0x11e   :  { %v619_v9 = vpop.eup %618  ;;  %v346_v10 = vmul.f32 %v617_v7, %v613_v5 }
 0x11f   :  { %355 = vst [vmem:[%s853_s5 + $0x28] sm:$0xff] %v347_v8 }
 0x120   :  { %v621_v11 = vpop.eup %620  ;;  %354 = vst [vmem:[%s853_s5 + $0x20] sm:$0xff] %v346_v10 }
 0x121   :  { %v623_v12 = vpop.eup %622  ;;  %v349_v13 = vmul.f32 %v621_v11, %v619_v9 }
 0x123   :  { %v625_v14 = vpop.eup %624  ;;  %357 = vst [vmem:[%s853_s5 + $0x38] sm:$0xff] %v349_v13 }
 0x124   :  { %v348_v15 = vmul.f32 %v625_v14, %v623_v12 }
 0x126   :  { %356 = vst [vmem:[%s853_s5 + $0x30] sm:$0xff] %v348_v15 }

</bundles_post_ra>
